<compile_context>
chip_gen: v5e
topology: v5e:2x2
jax: 0.10.0
libtpu: 0.0.40
codegen_flags: <defaults>
</compile_context>

<pallas_src>
import functools

import jax
import jax.numpy as jnp
from jax.experimental import pallas as pl
from jax.experimental.pallas import tpu as pltpu

# -----------------------------------------------------------------------------
# Hardware-aware constants / helpers
# -----------------------------------------------------------------------------
_LANE = 128


def _vmem_limit_bytes():
    try:
        cap = int(pltpu.get_tpu_info().vmem_capacity_bytes)
    except Exception:
        cap = 128 * 1024 * 1024
    # Tiled kernels have a small working set; stay well under physical VMEM so
    # the same code runs on v5e/v6e (128 MiB) and v7x (64 MiB).
    return max(32 * 1024 * 1024, min(cap // 2, 64 * 1024 * 1024))


_VMEM_LIMIT = _vmem_limit_bytes()


def _cparams(sem):
    return pltpu.CompilerParams(dimension_semantics=sem,
                                vmem_limit_bytes=_VMEM_LIMIT)


def _round_up(x, m):
    return (x + m - 1) // m * m


def _cpad(c):
    return _round_up(c, _LANE)


def _pick_div(n, candidates=(512, 256, 128)):
    for c in candidates:
        if n % c == 0:
            return c
    return n            # single full-width block (e.g. stem K = 32)


def _tile_m(m):
    """Row (M) tile size and padded M (multiple of the tile)."""
    if m >= 512:
        bm = 256
    else:
        bm = _round_up(max(m, 1), 8)
    return bm, _round_up(m, bm)


# -----------------------------------------------------------------------------
# EfficientNet-B7 configuration (width x2.0, depth x3.1):
# (repeats, kernel, stride, expand_ratio, in_ch, out_ch)
_B7_STAGES = [
    (4, 3, 1, 1, 64, 32),
    (7, 3, 2, 6, 32, 48),
    (7, 5, 2, 6, 48, 80),
    (10, 3, 2, 6, 80, 160),
    (10, 5, 1, 6, 160, 224),
    (13, 5, 2, 6, 224, 384),
    (4, 3, 1, 6, 384, 640),
]
STEM_CH = 64
HEAD_CH = 2560
NUM_CLASSES = 248
SE_RATIO = 0.25
_STEM_K = 3 * 3 * 3          # 27
_STEM_K_PAD = 32


# -----------------------------------------------------------------------------
# Pallas kernels
# -----------------------------------------------------------------------------
def _activate(y, act):
    if act == "swish":
        return y * jax.nn.sigmoid(y)
    if act == "sigmoid":
        return jax.nn.sigmoid(y)
    return y


def _matmul_kernel(x_ref, w_ref, s_ref, b_ref, o_ref, acc_ref, *, act):
    @pl.when(pl.program_id(2) == 0)
    def _():
        acc_ref[...] = jnp.zeros_like(acc_ref)

    acc_ref[...] += jnp.dot(x_ref[...].astype(jnp.bfloat16), w_ref[...],
                            preferred_element_type=jnp.float32)

    @pl.when(pl.program_id(2) == pl.num_programs(2) - 1)
    def _():
        y = acc_ref[...] * s_ref[...] + b_ref[...]     # folded BatchNorm
        o_ref[...] = _activate(y, act)


@functools.partial(jax.jit, static_argnames=("act",))
def matmul_bn_act(x, w, scale, bias, act="none"):
    """act((x @ w) * scale + bias); tiled M/N/K, bf16 MXU, f32 accumulate."""
    m, kd = x.shape
    nd = w.shape[1]
    bm, mp = _tile_m(m)
    if mp != m:
        x = jnp.pad(x, ((0, mp - m), (0, 0)))
    bn_ = _pick_div(nd)
    bk = _pick_div(kd)
    grid = (mp // bm, nd // bn_, kd // bk)
    out = pl.pallas_call(
        functools.partial(_matmul_kernel, act=act),
        out_shape=jax.ShapeDtypeStruct((mp, nd), jnp.float32),
        grid_spec=pltpu.PrefetchScalarGridSpec(
            num_scalar_prefetch=0, grid=grid,
            in_specs=[pl.BlockSpec((bm, bk), lambda i, j, k: (i, k)),
                      pl.BlockSpec((bk, bn_), lambda i, j, k: (k, j)),
                      pl.BlockSpec((1, bn_), lambda i, j, k: (0, j)),
                      pl.BlockSpec((1, bn_), lambda i, j, k: (0, j))],
            out_specs=pl.BlockSpec((bm, bn_), lambda i, j, k: (i, j)),
            scratch_shapes=[pltpu.VMEM((bm, bn_), jnp.float32)]),
        compiler_params=_cparams(("parallel", "parallel", "arbitrary")),
    )(x, w, scale.reshape(1, nd), bias.reshape(1, nd))
    return out if mp == m else out[:m]


def _dw_kernel(*refs, k, stride, ho, wo):
    """Depthwise KxK conv at stride s on phase-decomposed input, fused BN+swish.
    Also emits the SE squeeze (spatial mean) for the channel block."""
    p2 = stride * stride
    x_refs = refs[:p2]
    w_ref, s_ref, b_ref, y_ref, p_ref = refs[p2:]
    w = w_ref[...]                                   # (k, k, bc)
    acc = None
    for ky in range(k):
        for kx in range(k):
            ph = (ky % stride) * stride + (kx % stride)
            dy, dx = ky // stride, kx // stride
            tap = x_refs[ph][:, dy:dy + ho, dx:dx + wo, :]   # (n, ho, wo, bc)
            term = tap * w[ky, kx, :]
            acc = term if acc is None else acc + term
    y = acc * s_ref[0] + b_ref[0]                    # folded BatchNorm
    y = y * jax.nn.sigmoid(y)                        # swish
    y_ref[...] = y
    psum = jnp.sum(jnp.sum(y, axis=2), axis=1)       # (n, bc)
    p_ref[...] = psum * (1.0 / float(ho * wo))       # SE squeeze


@functools.partial(jax.jit, static_argnames=("k", "stride"))
def dwconv_bn_swish(x, w, scale, bias, k, stride):
    """Strided TF-SAME depthwise conv; stride folded via s*s phase views."""
    n, h, wd, c = x.shape
    ho = -(-h // stride)
    wo = -(-wd // stride)
    ph0, ph1 = _same_pad(h, k, stride)
    pw0, pw1 = _same_pad(wd, k, stride)
    hp_ph = ho + (k - 1) // stride
    wp_ph = wo + (k - 1) // stride
    eh = max(0, stride * hp_ph - (h + ph0 + ph1))
    ew = max(0, stride * wp_ph - (wd + pw0 + pw1))
    xp = jnp.pad(x, ((0, 0), (ph0, ph1 + eh), (pw0, pw1 + ew), (0, 0)))
    phases = [xp[:, py::stride, px::stride, :][:, :hp_ph, :wp_ph, :]
              for py in range(stride) for px in range(stride)]
    p2 = stride * stride
    bc = _pick_div(c, (256, 128))
    grid = (c // bc,)
    in_specs = ([pl.BlockSpec((n, hp_ph, wp_ph, bc),
                              lambda ci: (0, 0, 0, ci))] * p2
                + [pl.BlockSpec((k, k, bc), lambda ci: (0, 0, ci)),
                   pl.BlockSpec((1, bc), lambda ci: (0, ci)),
                   pl.BlockSpec((1, bc), lambda ci: (0, ci))])
    # TODO(synk): for very large spatial extents add halo-tiled row blocking
    # (manual DMA) so the per-channel-block spatial slab is not VMEM-resident.
    y, pooled = pl.pallas_call(
        functools.partial(_dw_kernel, k=k, stride=stride, ho=ho, wo=wo),
        out_shape=(jax.ShapeDtypeStruct((n, ho, wo, c), jnp.float32),
                   jax.ShapeDtypeStruct((n, c), jnp.float32)),
        grid=grid,
        in_specs=in_specs,
        out_specs=(pl.BlockSpec((n, ho, wo, bc), lambda ci: (0, 0, 0, ci)),
                   pl.BlockSpec((n, bc), lambda ci: (0, ci))),
        compiler_params=_cparams(("parallel",)),
    )(*phases, w, scale.reshape(1, c), bias.reshape(1, c))
    return y, pooled


def _se_gate_kernel(p_ref, w1_ref, b1_ref, w2_ref, b2_ref, g_ref):
    s1 = jnp.dot(p_ref[...].astype(jnp.bfloat16), w1_ref[...],
                 preferred_element_type=jnp.float32) + b1_ref[...]
    s1 = s1 * jax.nn.sigmoid(s1)                     # swish
    s2 = jnp.dot(s1.astype(jnp.bfloat16), w2_ref[...],
                 preferred_element_type=jnp.float32) + b2_ref[...]
    g_ref[...] = jax.nn.sigmoid(s2)                  # excitation gate


@jax.jit
def se_gate(pooled, w1, b1, w2, b2):
    n, ce = pooled.shape
    nse = w1.shape[1]
    return pl.pallas_call(
        _se_gate_kernel,
        out_shape=jax.ShapeDtypeStruct((n, ce), jnp.float32),
        grid=(1,),
        in_specs=[pl.BlockSpec((n, ce), lambda i: (0, 0)),
                  pl.BlockSpec((ce, nse), lambda i: (0, 0)),
                  pl.BlockSpec((1, nse), lambda i: (0, 0)),
                  pl.BlockSpec((nse, ce), lambda i: (0, 0)),
                  pl.BlockSpec((1, ce), lambda i: (0, 0))],
        out_specs=pl.BlockSpec((n, ce), lambda i: (0, 0)),
        compiler_params=_cparams(("arbitrary",)),
    )(pooled, w1, b1.reshape(1, nse), w2, b2.reshape(1, ce))


def _proj_kernel(x_ref, g_ref, w_ref, s_ref, b_ref, *rest, has_res):
    if has_res:
        r_ref, o_ref, acc_ref = rest
    else:
        o_ref, acc_ref = rest

    @pl.when(pl.program_id(3) == 0)
    def _():
        acc_ref[...] = jnp.zeros_like(acc_ref)

    xg = x_ref[0] * g_ref[0]                          # SE excite (bm,bk)*(1,bk)
    acc_ref[...] += jnp.dot(xg.astype(jnp.bfloat16), w_ref[...],
                            preferred_element_type=jnp.float32)

    @pl.when(pl.program_id(3) == pl.num_programs(3) - 1)
    def _():
        y = acc_ref[...] * s_ref[...] + b_ref[...]    # folded project BN
        if has_res:
            y = y + r_ref[0]                          # identity skip
        o_ref[0] = y


@jax.jit
def se_project(x, gate, wp, scale, bias, res):
    """SE excite + projection 1x1 conv + BN (+ optional residual), tiled."""
    n, hw, ce = x.shape
    cout = wp.shape[1]
    bm, hwp = _tile_m(hw)
    if hwp != hw:
        x = jnp.pad(x, ((0, 0), (0, hwp - hw), (0, 0)))
        if res is not None:
            res = jnp.pad(res, ((0, 0), (0, hwp - hw), (0, 0)))
    bn_ = _pick_div(cout)
    bk = _pick_div(ce)
    grid = (n, hwp // bm, cout // bn_, ce // bk)
    gate3 = gate.reshape(n, 1, ce)
    in_specs = [pl.BlockSpec((1, bm, bk), lambda b, i, j, kk: (b, i, kk)),
                pl.BlockSpec((1, 1, bk), lambda b, i, j, kk: (b, 0, kk)),
                pl.BlockSpec((bk, bn_), lambda b, i, j, kk: (kk, j)),
                pl.BlockSpec((1, bn_), lambda b, i, j, kk: (0, j)),
                pl.BlockSpec((1, bn_), lambda b, i, j, kk: (0, j))]
    args = [x, gate3, wp, scale.reshape(1, cout), bias.reshape(1, cout)]
    if res is not None:
        in_specs.append(pl.BlockSpec((1, bm, bn_), lambda b, i, j, kk: (b, i, j)))
        args.append(res)
    out = pl.pallas_call(
        functools.partial(_proj_kernel, has_res=res is not None),
        out_shape=jax.ShapeDtypeStruct((n, hwp, cout), jnp.float32),
        grid_spec=pltpu.PrefetchScalarGridSpec(
            num_scalar_prefetch=0, grid=grid,
            in_specs=in_specs,
            out_specs=pl.BlockSpec((1, bm, bn_), lambda b, i, j, kk: (b, i, j)),
            scratch_shapes=[pltpu.VMEM((bm, bn_), jnp.float32)]),
        compiler_params=_cparams(("parallel", "parallel", "parallel",
                                  "arbitrary")),
    )(*args)
    return out if hwp == hw else out[:, :hw]


def _head_fc_kernel(x_ref, wh_ref, sh_ref, bh_ref, wf_ref, bf_ref, o_ref):
    # Pool first, then the (linear) conv_head + bn1 and the FC: pooling
    # commutes with the linear head, so this matches the module up to fp order.
    pooled = jnp.mean(x_ref[...], axis=1)                        # (N, Cin)
    h = jnp.dot(pooled.astype(jnp.bfloat16), wh_ref[...],
                preferred_element_type=jnp.float32)
    h = h * sh_ref[...] + bh_ref[...]                            # bn1, no swish
    o_ref[...] = jnp.dot(h.astype(jnp.bfloat16), wf_ref[...],
                         preferred_element_type=jnp.float32) + bf_ref[...]


@jax.jit
def head_pool_fc(feat, wh, sh, bh, wf, bf):
    n, hw, c = feat.shape
    ch = wh.shape[1]
    nc = wf.shape[1]
    return pl.pallas_call(
        _head_fc_kernel,
        out_shape=jax.ShapeDtypeStruct((n, nc), jnp.float32),
        grid=(1,),
        in_specs=[pl.BlockSpec((n, hw, c), lambda i: (0, 0, 0)),
                  pl.BlockSpec((c, ch), lambda i: (0, 0)),
                  pl.BlockSpec((1, ch), lambda i: (0, 0)),
                  pl.BlockSpec((1, ch), lambda i: (0, 0)),
                  pl.BlockSpec((ch, nc), lambda i: (0, 0)),
                  pl.BlockSpec((1, nc), lambda i: (0, 0))],
        out_specs=pl.BlockSpec((n, nc), lambda i: (0, 0)),
        compiler_params=_cparams(("arbitrary",)),
    )(feat, wh, sh.reshape(1, ch), bh.reshape(1, ch), wf, bf.reshape(1, nc))


# -----------------------------------------------------------------------------
# Deterministic parameter construction (synthetic, no checkpoint load)
# -----------------------------------------------------------------------------
class ParamGen:
    def __init__(self, seed):
        self._key = jax.random.PRNGKey(seed)
        self._n = 0

    def _next(self):
        self._n += 1
        return jax.random.fold_in(self._key, self._n)

    def conv(self, shape, fan_in):
        return jax.random.normal(self._next(), shape, jnp.float32) * (1.0 / fan_in) ** 0.5

    def bias(self, c):
        return 0.02 * jax.random.normal(self._next(), (c,), jnp.float32)

    def bn(self, c, eps=1e-3):
        # Folded eval-mode BatchNorm: y = x * scale + bias
        gamma = 1.0 + 0.05 * jax.random.normal(self._next(), (c,), jnp.float32)
        beta = 0.05 * jax.random.normal(self._next(), (c,), jnp.float32)
        mean = 0.05 * jax.random.normal(self._next(), (c,), jnp.float32)
        var = 1.0 + 0.05 * jax.random.uniform(self._next(), (c,), jnp.float32)
        scale = gamma / jnp.sqrt(var + eps)
        return scale, beta - mean * scale


def _pad_vec(v, cp):
    return jnp.pad(v, (0, cp - v.shape[0]))


def _pad_bn(sb, cp):
    s, b = sb
    return _pad_vec(s, cp), _pad_vec(b, cp)


def build_params(seed=0):
    """All channel dims are zero-padded to multiples of 128; matmul weights are
    stored bf16 (MXU operands); padded channels carry exactly 0 activations."""
    pg = ParamGen(seed)
    stem_cp = _cpad(STEM_CH)
    params = {
        "stem_w": jnp.pad(pg.conv((_STEM_K, STEM_CH), _STEM_K),
                          ((0, _STEM_K_PAD - _STEM_K), (0, stem_cp - STEM_CH))
                          ).astype(jnp.bfloat16),
        "stem_bn": _pad_bn(pg.bn(STEM_CH), stem_cp),
        "blocks": [],
    }
    for (reps, k, stride, expand, cin, cout) in _B7_STAGES:
        for r in range(reps):
            b_in = cin if r == 0 else cout
            b_stride = stride if r == 0 else 1
            ce = b_in * expand
            cin_p, ce_p, cout_p = _cpad(b_in), _cpad(ce), _cpad(cout)
            blk = {"k": k, "stride": b_stride, "in": b_in, "out": cout,
                   "expand": expand}
            if expand != 1:
                blk["expand_w"] = jnp.pad(
                    pg.conv((b_in, ce), b_in),
                    ((0, cin_p - b_in), (0, ce_p - ce))).astype(jnp.bfloat16)
                blk["expand_bn"] = _pad_bn(pg.bn(ce), ce_p)
            blk["dw_w"] = jnp.pad(pg.conv((k, k, ce), k * k),
                                  ((0, 0), (0, 0), (0, ce_p - ce)))
            blk["dw_bn"] = _pad_bn(pg.bn(ce), ce_p)
            nse = max(1, int(b_in * SE_RATIO))
            blk["se_w1"] = jnp.pad(pg.conv((ce, nse), ce),
                                   ((0, ce_p - ce), (0, 0))).astype(jnp.bfloat16)
            blk["se_b1"] = pg.bias(nse)
            blk["se_w2"] = jnp.pad(pg.conv((nse, ce), nse),
                                   ((0, 0), (0, ce_p - ce))).astype(jnp.bfloat16)
            blk["se_b2"] = _pad_vec(pg.bias(ce), ce_p)
            blk["proj_w"] = jnp.pad(pg.conv((ce, cout), ce),
                                    ((0, ce_p - ce), (0, cout_p - cout))
                                    ).astype(jnp.bfloat16)
            blk["proj_bn"] = _pad_bn(pg.bn(cout), cout_p)
            params["blocks"].append(blk)
    head_in = _B7_STAGES[-1][5]
    head_in_p = _cpad(head_in)
    params["head_w"] = jnp.pad(pg.conv((head_in, HEAD_CH), head_in),
                               ((0, head_in_p - head_in), (0, 0))
                               ).astype(jnp.bfloat16)
    params["head_bn"] = pg.bn(HEAD_CH)
    nc_p = _cpad(NUM_CLASSES)
    params["fc_w"] = jnp.pad(pg.conv((HEAD_CH, NUM_CLASSES), HEAD_CH),
                             ((0, 0), (0, nc_p - NUM_CLASSES))).astype(jnp.bfloat16)
    params["fc_b"] = _pad_vec(pg.bias(NUM_CLASSES), nc_p)
    return params


# -----------------------------------------------------------------------------
# Forward pass (JAX glue around Pallas kernels)
# -----------------------------------------------------------------------------
def _same_pad(size, k, s):
    out = -(-size // s)
    pad = max((out - 1) * s + k - size, 0)
    return pad // 2, pad - pad // 2


def _im2col(x, k, s):
    n, h, w, c = x.shape
    ph0, ph1 = _same_pad(h, k, s)
    pw0, pw1 = _same_pad(w, k, s)
    xp = jnp.pad(x, ((0, 0), (ph0, ph1), (pw0, pw1), (0, 0)))
    ho = -(-h // s)
    wo = -(-w // s)
    cols = []
    for ky in range(k):
        for kx in range(k):
            cols.append(xp[:, ky:ky + (ho - 1) * s + 1:s,
                           kx:kx + (wo - 1) * s + 1:s, :])
    cols = jnp.concatenate(cols, axis=-1)
    return cols.reshape(n * ho * wo, k * k * c), ho, wo


def _mbconv(x, blk):
    n, h, w, _ = x.shape
    inputs = x
    k, stride = blk["k"], blk["stride"]

    # Expansion 1x1 conv + BN + swish (skipped when expand_ratio == 1).
    if blk["expand"] != 1:
        s, b = blk["expand_bn"]
        ce_p = blk["expand_w"].shape[1]
        y = matmul_bn_act(x.reshape(n * h * w, x.shape[3]), blk["expand_w"],
                          s, b, act="swish")
        x = y.reshape(n, h, w, ce_p)

    # Depthwise conv (TF SAME, stride folded in) + BN + swish (+ SE squeeze).
    s, b = blk["dw_bn"]
    y, pooled = dwconv_bn_swish(x, blk["dw_w"], s, b, k, stride)
    ho, wo, ce_p = y.shape[1], y.shape[2], y.shape[3]

    # SE gate (tiny) then fused excite + projection conv + BN (+ skip).
    gate = se_gate(pooled, blk["se_w1"], blk["se_b1"],
                   blk["se_w2"], blk["se_b2"])
    ps, pb = blk["proj_bn"]
    use_skip = (stride == 1 and blk["in"] == blk["out"])
    # drop_connect_rate is None in the module's Sequential -> plain identity add.
    res = inputs.reshape(n, ho * wo, inputs.shape[3]) if use_skip else None
    out = se_project(y.reshape(n, ho * wo, ce_p), gate, blk["proj_w"],
                     ps, pb, res)
    cout_p = blk["proj_w"].shape[1]
    return out.reshape(n, ho, wo, cout_p)


def efficientnet_b7_forward(x_nchw, params):
    x = jnp.transpose(x_nchw.astype(jnp.float32), (0, 2, 3, 1))  # NCHW -> NHWC
    n = x.shape[0]

    # Stem: conv 3x3 s2 SAME (im2col + tiled matmul) + BN0 (no swish in the
    # module's Sequential).  im2col K (27) padded to 32 for sublane alignment.
    # TODO(synk): at large resolutions a direct 3x3 stem kernel would avoid the
    # 9x im2col HBM blow-up; negligible at this toy spatial size.
    cols, ho, wo = _im2col(x, 3, 2)
    cols = jnp.pad(cols, ((0, 0), (0, _STEM_K_PAD - _STEM_K)))
    s, b = params["stem_bn"]
    y = matmul_bn_act(cols, params["stem_w"], s, b, act="none")
    x = y.reshape(n, ho, wo, -1)

    # 55 MBConv blocks.
    for blk in params["blocks"]:
        x = _mbconv(x, blk)

    # Head: avg pool, then conv_head 1x1 + bn1 (no swish), dropout (identity),
    # and the final Linear -- fused in one kernel.
    # TODO(synk): nn.Dropout(0.5) uses inference semantics (identity).
    n_, h, w, c = x.shape
    feat = x.reshape(n_, h * w, c)
    s, b = params["head_bn"]
    logits = head_pool_fc(feat, params["head_w"], s, b,
                          params["fc_w"], params["fc_b"])
    return logits[:, :NUM_CLASSES]


# -----------------------------------------------------------------------------
if __name__ == "__main__":
    key = jax.random.PRNGKey(0)
    # Small spatial size (32x32) keeps the 55-block B7 forward cheap while
    # preserving the exact channel/stride structure of the original module.
    x = jax.random.normal(key, (2, 3, 32, 32), jnp.float32)   # NCHW like PyTorch

    params = build_params(seed=0)
    y = efficientnet_b7_forward(x, params)
    y = jax.block_until_ready(y)

    assert y.shape == (2, NUM_CLASSES), y.shape
    assert bool(jnp.isfinite(y).all())
    print("KERNEL_OK")
</pallas_src>

<mosaic_0001>
module attributes {stable_mosaic.version = 11 : i64} {
  func.func @_matmul_kernel(%arg0: i32, %arg1: i32, %arg2: i32, %arg3: memref<256x32xf32, #tpu.memory_space<vmem>>, %arg4: memref<32x128xbf16, #tpu.memory_space<vmem>>, %arg5: memref<1x128xf32, #tpu.memory_space<vmem>>, %arg6: memref<1x128xf32, #tpu.memory_space<vmem>>, %arg7: memref<256x128xf32, #tpu.memory_space<vmem>>, %arg8: memref<256x128xf32, #tpu.memory_space<vmem>>) attributes {dimension_semantics = [#tpu.dimension_semantics<parallel>, #tpu.dimension_semantics<parallel>, #tpu.dimension_semantics<arbitrary>], iteration_bounds = array<i64: 2, 1, 1>, scalar_prefetch = 0 : i64, scratch_operands = 1 : i64, tpu.core_type = #tpu.core_type<tc>, window_params = [{transform_indices = @transform_0, window_bounds = array<i64: 256, 32>}, {transform_indices = @transform_1, window_bounds = array<i64: 32, 128>}, {transform_indices = @transform_2, window_bounds = array<i64: 1, 128>}, {transform_indices = @transform_3, window_bounds = array<i64: 1, 128>}, {transform_indices = @transform_4, window_bounds = array<i64: 256, 128>}]} {
    %c0_i32 = arith.constant 0 : i32
    %0 = arith.cmpi eq, %arg2, %c0_i32 : i32
    %1 = arith.extui %0 : i1 to i32
    %c0_i32_0 = arith.constant 0 : i32
    %2 = arith.cmpi ne, %1, %c0_i32_0 : i32
    scf.if %2 {
      %cst_10 = arith.constant 0.000000e+00 : f32
      %13 = vector.broadcast %cst_10 : f32 to vector<256x128xf32>
      %c0_11 = arith.constant 0 : index
      %c0_12 = arith.constant 0 : index
      %14 = vector.load %arg8[%c0_11, %c0_12] : memref<256x128xf32, #tpu.memory_space<vmem>>, vector<256x128xf32>
      tpu.vector_store %arg8[%c0_11, %c0_12], %13 {strides = array<i32>} : memref<256x128xf32, #tpu.memory_space<vmem>>, vector<256x128xf32>,
    } else {
    }
    %c0 = arith.constant 0 : index
    %c0_1 = arith.constant 0 : index
    %3 = vector.load %arg8[%c0, %c0_1] : memref<256x128xf32, #tpu.memory_space<vmem>>, vector<256x128xf32>
    %c0_2 = arith.constant 0 : index
    %c0_3 = arith.constant 0 : index
    %4 = vector.load %arg3[%c0_2, %c0_3] : memref<256x32xf32, #tpu.memory_space<vmem>>, vector<256x32xf32>
    %5 = arith.truncf %4 : vector<256x32xf32> to vector<256x32xbf16>
    %c0_4 = arith.constant 0 : index
    %c0_5 = arith.constant 0 : index
    %6 = vector.load %arg4[%c0_4, %c0_5] : memref<32x128xbf16, #tpu.memory_space<vmem>>, vector<32x128xbf16>
    %cst = arith.constant dense<0.000000e+00> : vector<256x128xf32>
    %7 = tpu.matmul %5, %6, %cst {dimension_numbers = #tpu.dot_dimension_numbers<[1], [0], [0], [1], [0, 0, 1, 1], [], []>} : vector<256x32xbf16>, vector<32x128xbf16>, vector<256x128xf32> -> vector<256x128xf32>
    %8 = arith.addf %3, %7 : vector<256x128xf32>
    %c0_6 = arith.constant 0 : index
    %c0_7 = arith.constant 0 : index
    %9 = vector.load %arg8[%c0_6, %c0_7] : memref<256x128xf32, #tpu.memory_space<vmem>>, vector<256x128xf32>
    tpu.vector_store %arg8[%c0_6, %c0_7], %8 {strides = array<i32>} : memref<256x128xf32, #tpu.memory_space<vmem>>, vector<256x128xf32>,
    %c0_i32_8 = arith.constant 0 : i32
    %10 = arith.cmpi eq, %arg2, %c0_i32_8 : i32
    %11 = arith.extui %10 : i1 to i32
    %c0_i32_9 = arith.constant 0 : i32
    %12 = arith.cmpi ne, %11, %c0_i32_9 : i32
    scf.if %12 {
      %c0_10 = arith.constant 0 : index
      %c0_11 = arith.constant 0 : index
      %13 = vector.load %arg8[%c0_10, %c0_11] : memref<256x128xf32, #tpu.memory_space<vmem>>, vector<256x128xf32>
      %c0_12 = arith.constant 0 : index
      %c0_13 = arith.constant 0 : index
      %14 = vector.load %arg5[%c0_12, %c0_13] : memref<1x128xf32, #tpu.memory_space<vmem>>, vector<1x128xf32>
      %15 = vector.broadcast %14 : vector<1x128xf32> to vector<256x128xf32>
      %16 = arith.mulf %13, %15 : vector<256x128xf32>
      %c0_14 = arith.constant 0 : index
      %c0_15 = arith.constant 0 : index
      %17 = vector.load %arg6[%c0_14, %c0_15] : memref<1x128xf32, #tpu.memory_space<vmem>>, vector<1x128xf32>
      %18 = vector.broadcast %17 : vector<1x128xf32> to vector<256x128xf32>
      %19 = arith.addf %16, %18 : vector<256x128xf32>
      %c0_16 = arith.constant 0 : index
      %c0_17 = arith.constant 0 : index
      %20 = vector.load %arg7[%c0_16, %c0_17] : memref<256x128xf32, #tpu.memory_space<vmem>>, vector<256x128xf32>
      tpu.vector_store %arg7[%c0_16, %c0_17], %19 {strides = array<i32>} : memref<256x128xf32, #tpu.memory_space<vmem>>, vector<256x128xf32>,
    } else {
    }
    return
  }
  func.func @transform_0(%arg0: i32, %arg1: i32, %arg2: i32) -> (i32, i32) {
    %c0_i32 = arith.constant 0 : i32
    return %arg0, %arg2 : i32, i32
  }
  func.func @transform_1(%arg0: i32, %arg1: i32, %arg2: i32) -> (i32, i32) {
    %c0_i32 = arith.constant 0 : i32
    return %arg2, %arg1 : i32, i32
  }
  func.func @transform_2(%arg0: i32, %arg1: i32, %arg2: i32) -> (i32, i32) {
    %c0_i32 = arith.constant 0 : i32
    %c0_i32_0 = arith.constant 0 : i32
    return %c0_i32, %arg1 : i32, i32
  }
  func.func @transform_3(%arg0: i32, %arg1: i32, %arg2: i32) -> (i32, i32) {
    %c0_i32 = arith.constant 0 : i32
    %c0_i32_0 = arith.constant 0 : i32
    return %c0_i32, %arg1 : i32, i32
  }
  func.func @transform_4(%arg0: i32, %arg1: i32, %arg2: i32) -> (i32, i32) {
    %c0_i32 = arith.constant 0 : i32
    return %arg0, %arg1 : i32, i32
  }
}

</mosaic_0001>

<bundles_post_ra>
// kernel: matmul_bn_act.1
= control target key start
LH: loop header
LB: loop body
LE: loop exit
PB: predicated region body
PF: predicated region fallthrough
CT: control target
= control target key end

     0   :  { %9 = vsyncpa [#allocation4], 0  ;;  %s1383_s0 = inlined_call_operand.vmem [shape: f32[512,32], index: 0, kind: input, shape index: {}]   ;;  %s1384_s1 = inlined_call_operand.vmem [shape: bf16[32,128], index: 1, kind: input, shape index: {}]   ;;  %s1385_s2 = inlined_call_operand.vmem [shape: f32[1,128], index: 2, kind: input, shape index: {}]   ;;  %s1386_s3 = inlined_call_operand.vmem [shape: f32[1,128], index: 3, kind: input, shape index: {}]   ;;  %s1387_s4 = inlined_call_operand.hbm [shape: f32[512,128], index: 4, kind: output, shape index: {}]  }
   0x1   :  { %11 = vsyncpa [#allocation4 + $0x1], 0  ;;  %s1118_s15 = smov 0   ;;  %s1120_s16 = smov 0  }
   0x2   :  { %s1122_s17 = smov 0   ;;  %s1124_s18 = smov 0  }
   0x3   :  { %s1126_s19 = smov 0   ;;  %s1128_s20 = smov 0  }
   0x4 LB: > { %s903_s21 = sadd.s32 4294967295, %s1089_s20   ;;  %s904_s22 = sadd.s32 4294967294, %s1089_s20   ;;  %s1089_s20 = sphi %s1128_s20, %s17_s20   ;;  %s1085_s19 = sphi %s1126_s19, %s1394_s19   ;;  %s1081_s18 = sphi %s1124_s18, %s1393_s18   ;;  %s1077_s17 = sphi %s1122_s17, %s1392_s17   ;;  %s1073_s16 = sphi %s1120_s16, %s1391_s16   ;;  %s1069_s15 = sphi %s1118_s15, %s1390_s15  }
   0x5   : > { %s36_s23 = sadd.s32 1, %s1085_s19  ;;  %s153_s24 = sadd.s32 1, %s1077_s17 }
   0x6   : > { %p38_p0 = scmp.ge.s32.totalorder %s36_s23, 2  ;;  %p163_p1 = scmp.ne.s32.totalorder %s1077_s17, %s1073_s16 }
   0x7   : > { %p164_p2 = scmp.eq.s32.totalorder %s903_s21, 1  ;;  %p169_p3 = scmp.ne.s32.totalorder %s1073_s16, %s1069_s15 }
   0x8   : > { %s1396_s23 = smov (%p38_p0, %s36_s23), 0  ;;  %p170_p5 = scmp.eq.s32.totalorder %s904_s22, 1 }
   0x9   : > { %p1158_p4 = por %p164_p2, %p163_p1  ;;  %s148_s26 = ssub.s32 %s1085_s19, %s1396_s23 }
   0xa   : > { %p910_p6 = scmp.ge.s32.totalorder %s1089_s20, 1  ;;  %p151_p7 = scmp.eq.s32.totalorder %s148_s26, 0 }
   0xb   : > { %p1165_p8 = por %p170_p5, %p169_p3  ;;  %p224_p9 = scmp.lt.s32.totalorder %s1089_s20, 3 }
   0xc   : > { %s1171_s28 = scalar_select %p151_p7, %s1077_s17, %s153_s24  }
   0xd   : > { %p225_p10 = pnand %p910_p6, %p224_p9 }
   0xe   : > { %s912_s5 = sshll.u32 (!%p225_p10), %s1081_s18, 5  ;;  %s264_s12 = sand.u32 (!%p225_p10), 1, %s1073_s16  }
   0xf   : > { %228 = sbr.rel (%p225_p10) target bundleno = 226 (0xe2), region = 36  ;;  %p268_p11 = scmp.lt.s32.totalorder (!%p225_p10), %s912_s5, 63 }
  0x10   : > { %s911_s21 = sshll.u32 (!%p225_p10), %s264_s12, 8  ;;  %s945_s29 = sshll.u32 (!%p225_p10), %s1081_s18, 8 }
  0x11   : > { %s1250_s26 = scalar_lea.vmem (!%p225_p10), [#allocation3], %s911_s21  ;;  %s779_s6 = scalar_lea.hbm (!%p225_p10), %s1387_s4, %s945_s29 }
  0x12   : > { %s780_s18 = sshll.u32 (!%p225_p10), %s1250_s26, 4  ;;  %s782_s7 = sshll.u32 (!%p225_p10), %s779_s6, 4  ;;  %s781_s18 = int_to_ptr.vmem [resolvable:$true] %s780_s18  ;;  %s783_s7 = int_to_ptr.hbm [resolvable:$true] %s782_s7 }
  0x13   : > { %s1025_s9 = sshra.s32 (!%p225_p10), %s783_s7, 4  ;;  %s1031_s14 = scalar_lea.hbm (!%p225_p10), %s1387_s4, 512  ;;  %s1026_s9 = int_to_ptr.hbm [resolvable:$true] %s1025_s9 }
  0x14   : > { %v944_v0 = vld [vmem:[%s1384_s1 + $0x8] sm:$0xff]  ;;  %v943_v1 = vld [vmem:[%s1384_s1] sm:$0xff]  ;;  %s1398_s5 = smov (!%p268_p11, %s912_s5), 63  ;;  %vm425_vm0 = vcmask 261120   ;;  %s1027_s10 = scalar_lea.hbm %s1026_s9, 256 }
  0x15   : > { %480 = vmatpush.bf16.msra.mxu0 %v944_v0  ;;  %946 = vmatpush.bf16.msra.mxu1 %v944_v0  ;;  %s913_s8 = sshll.u32 %s1398_s5, 3  ;;  %v1237_v50 = vld [vmem:[%s1385_s2] ss:$0 sm:$0xff]  ;;  %p1028_p12 = scmp.ne.s32.totalorder %s1026_s9, %s1027_s10 }
  0x16   : > { %947 = vmatpush.bf16.msra.mxu2 %v944_v0  ;;  %948 = vmatpush.bf16.msra.mxu3 %v944_v0  ;;  %s1183_s11 = scalar_lea.vmem %s1383_s0, %s913_s8  ;;  %v1244_v51 = vld [vmem:[%s1386_s3] ss:$0 sm:$0xff]  ;;  %s767_s8 = scalar_lea.sflag [#allocation4], %s264_s12 }
  0x17   : > { %v361_v2 = vld [vmem:[%s1183_s11] sm:$0xff]  ;;  %v362_v3 = vld [vmem:[%s1183_s11 + $0x8] sm:$0xff]  ;;  %v363_v14 = vld [vmem:[%s1183_s11 + $0x10] sm:$0xff]  ;;  %p1029_p13 = pnand %p1028_p12, %p1158_p4  ;;  %p1032_p1 = scmp.lt.s32.totalorder %s1026_s9, %s1387_s4 }
  0x18   : > { %v369_v4 = vld [vmem:[%s1183_s11 + $0x40] sm:$0xff]  ;;  %v393_v5 = vpack.c.bf16 %v362_v3, %v361_v2  ;;  %v370_v6 = vld [vmem:[%s1183_s11 + $0x48] sm:$0xff]  ;;  %v364_v15 = vld [vmem:[%s1183_s11 + $0x18] sm:$0xff]  ;;  %p1033_p2 = scmp.lt.s32.totalorder %s1031_s14, %s1027_s10 }
  0x19   : > { %481 = vmatpush.bf16.msra.mxu0 %v943_v1  ;;  %949 = vmatpush.bf16.msra.mxu1 %v943_v1  ;;  %v377_v7 = vld [vmem:[%s1183_s11 + $0x80] sm:$0xff]  ;;  %v378_v8 = vld [vmem:[%s1183_s11 + $0x88] sm:$0xff]  ;;  %v397_v9 = vpack.c.bf16 %v370_v6, %v369_v4  ;;  %v371_v16 = vld [vmem:[%s1183_s11 + $0x50] sm:$0xff]  ;;  %v394_v22 = vpack.c.bf16 %v364_v15, %v363_v14  ;;  %p1030_p0 = pneg %p1029_p13 }
  0x1a   : > { %950 = vmatpush.bf16.msra.mxu2 %v943_v1  ;;  %951 = vmatpush.bf16.msra.mxu3 %v943_v1  ;;  %v401_v10 = vpack.c.bf16 %v378_v8, %v377_v7  ;;  %v385_v11 = vld [vmem:[%s1183_s11 + $0xc0] sm:$0xff]  ;;  %v386_v12 = vld [vmem:[%s1183_s11 + $0xc8] sm:$0xff]  ;;  %v372_v17 = vld [vmem:[%s1183_s11 + $0x58] sm:$0xff]  ;;  %p1034_p3 = por %p1033_p2, %p1032_p1 }
  0x1b   : > { %v405_v13 = vpack.c.bf16 %v386_v12, %v385_v11  ;;  %v379_v18 = vld [vmem:[%s1183_s11 + $0x90] sm:$0xff]  ;;  %v380_v19 = vld [vmem:[%s1183_s11 + $0x98] sm:$0xff]  ;;  %v398_v23 = vpack.c.bf16 %v372_v17, %v371_v16  ;;  %v365_v26 = vld [vmem:[%s1183_s11 + $0x20] sm:$0xff] }
  0x1c   : > { %922 = vmatmul.msk.bf16.vlgmr.msra.gmra.mxu0 %vm425_vm0, %v393_v5  ;;  %926 = vmatmul.msk.bf16.vlgmr.msra.gmra.mxu1 %vm425_vm0, %v397_v9  ;;  %v387_v20 = vld [vmem:[%s1183_s11 + $0xd0] sm:$0xff]  ;;  %v388_v21 = vld [vmem:[%s1183_s11 + $0xd8] sm:$0xff]  ;;  %v402_v24 = vpack.c.bf16 %v380_v19, %v379_v18  ;;  %v366_v27 = vld [vmem:[%s1183_s11 + $0x28] sm:$0xff]  ;;  %p1035_p5 = pnand %p1034_p3, %p1030_p0 }
  0x1d   : > { %930 = vmatmul.msk.bf16.vlgmr.msra.gmra.mxu2 %vm425_vm0, %v401_v10  ;;  %934 = vmatmul.msk.bf16.vlgmr.msra.gmra.mxu3 %vm425_vm0, %v405_v13  ;;  %v406_v25 = vpack.c.bf16 %v388_v21, %v387_v20  ;;  %v373_v28 = vld [vmem:[%s1183_s11 + $0x60] sm:$0xff]  ;;  %v374_v29 = vld [vmem:[%s1183_s11 + $0x68] sm:$0xff]  ;;  %v395_v34 = vpack.c.bf16 %v366_v27, %v365_v26  ;;  %v367_v38 = vld [vmem:[%s1183_s11 + $0x30] sm:$0xff] }
  0x1e   : > { %v381_v30 = vld [vmem:[%s1183_s11 + $0xa0] sm:$0xff]  ;;  %v382_v31 = vld [vmem:[%s1183_s11 + $0xa8] sm:$0xff]  ;;  %v399_v35 = vpack.c.bf16 %v374_v29, %v373_v28  ;;  %v368_v39 = vld [vmem:[%s1183_s11 + $0x38] sm:$0xff] }
  0x1f   : > { %v389_v32 = vld [vmem:[%s1183_s11 + $0xe0] sm:$0xff]  ;;  %v390_v33 = vld [vmem:[%s1183_s11 + $0xe8] sm:$0xff]  ;;  %v403_v36 = vpack.c.bf16 %v382_v31, %v381_v30  ;;  %v375_v40 = vld [vmem:[%s1183_s11 + $0x70] sm:$0xff]  ;;  %v396_v46 = vpack.c.bf16 %v368_v39, %v367_v38 }
  0x20   : > { %v407_v37 = vpack.c.bf16 %v390_v33, %v389_v32  ;;  %v376_v41 = vld [vmem:[%s1183_s11 + $0x78] sm:$0xff]  ;;  %v383_v42 = vld [vmem:[%s1183_s11 + $0xb0] sm:$0xff] }
  0x21   : > { %v384_v43 = vld [vmem:[%s1183_s11 + $0xb8] sm:$0xff]  ;;  %v391_v44 = vld [vmem:[%s1183_s11 + $0xf0] sm:$0xff]  ;;  %v400_v47 = vpack.c.bf16 %v376_v41, %v375_v40 }
  0x22   : > { %v392_v45 = vld [vmem:[%s1183_s11 + $0xf8] sm:$0xff]  ;;  %v404_v48 = vpack.c.bf16 %v384_v43, %v383_v42 }
  0x23   : > { %v408_v49 = vpack.c.bf16 %v392_v45, %v391_v44 }
  0x2c   : > { %923 = vmatmul.msk.bf16.gmra.mxu0 %vm425_vm0, %v394_v22  ;;  %927 = vmatmul.msk.bf16.gmra.mxu1 %vm425_vm0, %v398_v23 }
  0x2d   : > { %931 = vmatmul.msk.bf16.gmra.mxu2 %vm425_vm0, %v402_v24  ;;  %935 = vmatmul.msk.bf16.gmra.mxu3 %vm425_vm0, %v406_v25 }
  0x3c   : > { %924 = vmatmul.msk.bf16.gmra.mxu0 %vm425_vm0, %v395_v34  ;;  %928 = vmatmul.msk.bf16.gmra.mxu1 %vm425_vm0, %v399_v35 }
  0x3d   : > { %932 = vmatmul.msk.bf16.gmra.mxu2 %vm425_vm0, %v403_v36  ;;  %936 = vmatmul.msk.bf16.gmra.mxu3 %vm425_vm0, %v407_v37 }
  0x4c   : > { %925 = vmatmul.msk.bf16.gmra.mxu0 %vm425_vm0, %v396_v46  ;;  %929 = vmatmul.msk.bf16.gmra.mxu1 %vm425_vm0, %v400_v47 }
  0x4d   : > { %933 = vmatmul.msk.bf16.gmra.mxu2 %vm425_vm0, %v404_v48  ;;  %937 = vmatmul.msk.bf16.gmra.mxu3 %vm425_vm0, %v408_v49 }
  0x99   : > { %v483_v52 = vpop.f32.mrf.mxu0  ;;  %v503_v54 = vpop.f32.mrf.mxu1 }
  0x9a   : > { %v666_v53 = vmul.f32 %v1237_v50, %v483_v52  ;;  %v674_v55 = vmul.f32 %v1237_v50, %v503_v54 }
  0x9c   : > { %v702_v56 = vadd.f32 %v1244_v51, %v666_v53  ;;  %v710_v57 = vadd.f32 %v1244_v51, %v674_v55 }
  0x9e   : > { %734 = vst [vmem:[%s1250_s26] sm:$0xff] %v702_v56 }
  0x9f   : > { %742 = vst [vmem:[%s1250_s26 + $0x40] sm:$0xff] %v710_v57 }
  0xa0   : > { %v523_v58 = vpop.f32.mrf.mxu2  ;;  %v543_v60 = vpop.f32.mrf.mxu3 }
  0xa1   : > { %v682_v59 = vmul.f32 %v1237_v50, %v523_v58  ;;  %v485_v61 = vpop.f32.mrf.mxu0  ;;  %v690_v62 = vmul.f32 %v1237_v50, %v543_v60  ;;  %v505_v0 = vpop.f32.mrf.mxu1 }
  0xa2   : > { %v667_v63 = vmul.f32 %v1237_v50, %v485_v61  ;;  %v675_v2 = vmul.f32 %v1237_v50, %v505_v0 }
  0xa3   : > { %v718_v1 = vadd.f32 %v1244_v51, %v682_v59  ;;  %v726_v3 = vadd.f32 %v1244_v51, %v690_v62 }
  0xa4   : > { %v703_v4 = vadd.f32 %v1244_v51, %v667_v63  ;;  %v711_v5 = vadd.f32 %v1244_v51, %v675_v2 }
  0xa5   : > { %750 = vst [vmem:[%s1250_s26 + $0x80] sm:$0xff] %v718_v1 }
  0xa6   : > { %758 = vst [vmem:[%s1250_s26 + $0xc0] sm:$0xff] %v726_v3 }
  0xa7   : > { %735 = vst [vmem:[%s1250_s26 + $0x8] sm:$0xff] %v703_v4 }
  0xa8   : > { %743 = vst [vmem:[%s1250_s26 + $0x48] sm:$0xff] %v711_v5  ;;  %v525_v6 = vpop.f32.mrf.mxu2  ;;  %v545_v8 = vpop.f32.mrf.mxu3 }
  0xa9   : > { %v683_v7 = vmul.f32 %v1237_v50, %v525_v6  ;;  %v488_v9 = vpop.f32.mrf.mxu0  ;;  %v691_v10 = vmul.f32 %v1237_v50, %v545_v8  ;;  %v508_v12 = vpop.f32.mrf.mxu1 }
  0xaa   : > { %v668_v11 = vmul.f32 %v1237_v50, %v488_v9  ;;  %v676_v14 = vmul.f32 %v1237_v50, %v508_v12 }
  0xab   : > { %v719_v13 = vadd.f32 %v1244_v51, %v683_v7  ;;  %v727_v15 = vadd.f32 %v1244_v51, %v691_v10 }
  0xac   : > { %v704_v16 = vadd.f32 %v1244_v51, %v668_v11  ;;  %v712_v17 = vadd.f32 %v1244_v51, %v676_v14 }
  0xad   : > { %751 = vst [vmem:[%s1250_s26 + $0x88] sm:$0xff] %v719_v13 }
  0xae   : > { %759 = vst [vmem:[%s1250_s26 + $0xc8] sm:$0xff] %v727_v15 }
  0xaf   : > { %736 = vst [vmem:[%s1250_s26 + $0x10] sm:$0xff] %v704_v16 }
  0xb0   : > { %744 = vst [vmem:[%s1250_s26 + $0x50] sm:$0xff] %v712_v17  ;;  %v528_v18 = vpop.f32.mrf.mxu2  ;;  %v548_v20 = vpop.f32.mrf.mxu3 }
  0xb1   : > { %v684_v19 = vmul.f32 %v1237_v50, %v528_v18  ;;  %v490_v21 = vpop.f32.mrf.mxu0  ;;  %v692_v22 = vmul.f32 %v1237_v50, %v548_v20  ;;  %v510_v24 = vpop.f32.mrf.mxu1 }
  0xb2   : > { %v669_v23 = vmul.f32 %v1237_v50, %v490_v21  ;;  %v677_v26 = vmul.f32 %v1237_v50, %v510_v24 }
  0xb3   : > { %v720_v25 = vadd.f32 %v1244_v51, %v684_v19  ;;  %v728_v27 = vadd.f32 %v1244_v51, %v692_v22 }
  0xb4   : > { %v705_v28 = vadd.f32 %v1244_v51, %v669_v23  ;;  %v713_v29 = vadd.f32 %v1244_v51, %v677_v26 }
  0xb5   : > { %752 = vst [vmem:[%s1250_s26 + $0x90] sm:$0xff] %v720_v25 }
  0xb6   : > { %760 = vst [vmem:[%s1250_s26 + $0xd0] sm:$0xff] %v728_v27 }
  0xb7   : > { %737 = vst [vmem:[%s1250_s26 + $0x18] sm:$0xff] %v705_v28 }
  0xb8   : > { %745 = vst [vmem:[%s1250_s26 + $0x58] sm:$0xff] %v713_v29  ;;  %v530_v30 = vpop.f32.mrf.mxu2  ;;  %v550_v32 = vpop.f32.mrf.mxu3 }
  0xb9   : > { %v685_v31 = vmul.f32 %v1237_v50, %v530_v30  ;;  %v493_v33 = vpop.f32.mrf.mxu0  ;;  %v693_v34 = vmul.f32 %v1237_v50, %v550_v32  ;;  %v513_v36 = vpop.f32.mrf.mxu1 }
  0xba   : > { %v670_v35 = vmul.f32 %v1237_v50, %v493_v33  ;;  %v678_v38 = vmul.f32 %v1237_v50, %v513_v36 }
  0xbb   : > { %v721_v37 = vadd.f32 %v1244_v51, %v685_v31  ;;  %v729_v39 = vadd.f32 %v1244_v51, %v693_v34 }
  0xbc   : > { %v706_v40 = vadd.f32 %v1244_v51, %v670_v35  ;;  %v714_v41 = vadd.f32 %v1244_v51, %v678_v38 }
  0xbd   : > { %753 = vst [vmem:[%s1250_s26 + $0x98] sm:$0xff] %v721_v37 }
  0xbe   : > { %761 = vst [vmem:[%s1250_s26 + $0xd8] sm:$0xff] %v729_v39 }
  0xbf   : > { %738 = vst [vmem:[%s1250_s26 + $0x20] sm:$0xff] %v706_v40 }
  0xc0   : > { %746 = vst [vmem:[%s1250_s26 + $0x60] sm:$0xff] %v714_v41  ;;  %v533_v42 = vpop.f32.mrf.mxu2  ;;  %v553_v44 = vpop.f32.mrf.mxu3 }
  0xc1   : > { %v686_v43 = vmul.f32 %v1237_v50, %v533_v42  ;;  %v495_v45 = vpop.f32.mrf.mxu0  ;;  %v694_v46 = vmul.f32 %v1237_v50, %v553_v44  ;;  %v515_v48 = vpop.f32.mrf.mxu1 }
  0xc2   : > { %v671_v47 = vmul.f32 %v1237_v50, %v495_v45  ;;  %v679_v52 = vmul.f32 %v1237_v50, %v515_v48 }
  0xc3   : > { %v722_v49 = vadd.f32 %v1244_v51, %v686_v43  ;;  %v730_v53 = vadd.f32 %v1244_v51, %v694_v46 }
  0xc4   : > { %v707_v54 = vadd.f32 %v1244_v51, %v671_v47  ;;  %v715_v55 = vadd.f32 %v1244_v51, %v679_v52 }
  0xc5   : > { %754 = vst [vmem:[%s1250_s26 + $0xa0] sm:$0xff] %v722_v49 }
  0xc6   : > { %762 = vst [vmem:[%s1250_s26 + $0xe0] sm:$0xff] %v730_v53 }
  0xc7   : > { %739 = vst [vmem:[%s1250_s26 + $0x28] sm:$0xff] %v707_v54 }
  0xc8   : > { %747 = vst [vmem:[%s1250_s26 + $0x68] sm:$0xff] %v715_v55  ;;  %v535_v56 = vpop.f32.mrf.mxu2  ;;  %v555_v58 = vpop.f32.mrf.mxu3 }
  0xc9   : > { %v687_v57 = vmul.f32 %v1237_v50, %v535_v56  ;;  %v498_v59 = vpop.f32.mrf.mxu0  ;;  %v695_v60 = vmul.f32 %v1237_v50, %v555_v58  ;;  %v518_v62 = vpop.f32.mrf.mxu1 }
  0xca   : > { %v672_v61 = vmul.f32 %v1237_v50, %v498_v59  ;;  %v680_v0 = vmul.f32 %v1237_v50, %v518_v62 }
  0xcb   : > { %v723_v63 = vadd.f32 %v1244_v51, %v687_v57  ;;  %v731_v1 = vadd.f32 %v1244_v51, %v695_v60 }
  0xcc   : > { %v708_v2 = vadd.f32 %v1244_v51, %v672_v61  ;;  %v716_v3 = vadd.f32 %v1244_v51, %v680_v0 }
  0xcd   : > { %755 = vst [vmem:[%s1250_s26 + $0xa8] sm:$0xff] %v723_v63 }
  0xce   : > { %763 = vst [vmem:[%s1250_s26 + $0xe8] sm:$0xff] %v731_v1 }
  0xcf   : > { %740 = vst [vmem:[%s1250_s26 + $0x30] sm:$0xff] %v708_v2 }
  0xd0   : > { %748 = vst [vmem:[%s1250_s26 + $0x70] sm:$0xff] %v716_v3  ;;  %v538_v4 = vpop.f32.mrf.mxu2  ;;  %v558_v6 = vpop.f32.mrf.mxu3 }
  0xd1   : > { %v688_v5 = vmul.f32 %v1237_v50, %v538_v4  ;;  %v500_v7 = vpop.f32.mrf.mxu0  ;;  %v696_v8 = vmul.f32 %v1237_v50, %v558_v6  ;;  %v520_v10 = vpop.f32.mrf.mxu1 }
  0xd2   : > { %v673_v9 = vmul.f32 %v1237_v50, %v500_v7  ;;  %v681_v12 = vmul.f32 %v1237_v50, %v520_v10 }
  0xd3   : > { %v724_v11 = vadd.f32 %v1244_v51, %v688_v5  ;;  %v732_v13 = vadd.f32 %v1244_v51, %v696_v8 }
  0xd4   : > { %v709_v14 = vadd.f32 %v1244_v51, %v673_v9  ;;  %v717_v15 = vadd.f32 %v1244_v51, %v681_v12 }
  0xd5   : > { %756 = vst [vmem:[%s1250_s26 + $0xb0] sm:$0xff] %v724_v11 }
  0xd6   : > { %764 = vst [vmem:[%s1250_s26 + $0xf0] sm:$0xff] %v732_v13 }
  0xd7   : > { %741 = vst [vmem:[%s1250_s26 + $0x38] sm:$0xff] %v709_v14 }
  0xd8   : > { %749 = vst [vmem:[%s1250_s26 + $0x78] sm:$0xff] %v717_v15  ;;  %v540_v16 = vpop.f32.mrf.mxu2  ;;  %v560_v18 = vpop.f32.mrf.mxu3 }
  0xd9   : > { %v689_v17 = vmul.f32 %v1237_v50, %v540_v16  ;;  %v697_v19 = vmul.f32 %v1237_v50, %v560_v18 }
  0xdb   : > { %v725_v20 = vadd.f32 %v1244_v51, %v689_v17  ;;  %v733_v21 = vadd.f32 %v1244_v51, %v697_v19 }
  0xdd   : > { %757 = vst [vmem:[%s1250_s26 + $0xb8] sm:$0xff] %v725_v20 }
  0xde   : > { %765 = vst [vmem:[%s1250_s26 + $0xf8] sm:$0xff] %v733_v21 }
  0xdf   : > { %1038 = shalt.err (!%p1035_p5)
}
  0xe0   : > { %s1091_s12 = smov 128   ;;  %s1092_s24 = smov 8  }
  0xe1   : > { %952 = dma.vmem_to_hbm [thread:$0]  (%p1158_p4), %s781_s18, 4096, %s783_s7, %s767_s8, %s1091_s12, %s1091_s12, %s1092_s24  }
  0xe2 PF: > { %p958_p6 = scmp.ge.s32.totalorder %s1089_s20, 2  ;;  %s797_s26 = sand.u32 1, %s1069_s15  }
  0xe3   : > { %s798_s29 = scalar_lea.sflag [#allocation4], %s797_s26 }
  0xe4   : > { %p955_p7 = pnand %p958_p6, %p1165_p8 }
  0xe6   : > { %p956_p9 = pneg %p955_p7 }
  0xe8   : > { %1064 = dma.done.wait (%p956_p9), %s798_s29, 4096  }
  0xe9   : > { %1066 = vsyncadd (%p956_p9), %s798_s29, 4294963200  ;;  %s17_s20 = sadd.s32 1, %s1089_s20   ;;  %s1390_s15 = smov %s1073_s16 }
  0xea   : > { %p14_p10 = scmp.ge.s32.totalorder %s17_s20, 4   ;;  %s1391_s16 = smov %s1077_s17 }
  0xeb   : > { %s1392_s17 = smov %s1171_s28  ;;  %s1393_s18 = smov %s1085_s19 }
  0xec   : > { %s1394_s19 = smov %s1396_s23  ;;  %16 = sbr.rel (!%p14_p10) target bundleno = 4 (0x4), region = 88 }
  0xf1   :  { %804 = vsyncpa [#allocation4], 1 }
  0xf2   :  { %806 = vsyncpa [#allocation4 + $0x1], 1 }

</bundles_post_ra>
